<compile_context>
chip_gen: v7x
topology: tpu7x:2x2x1
jax: 0.10.0
libtpu: 0.0.40
codegen_flags: <defaults>
</compile_context>

<pallas_src>
import functools

import jax
import jax.numpy as jnp
from jax.experimental import pallas as pl
from jax.experimental.pallas import tpu as pltpu


# ----------------------------------------------------------------------------
# Kernel 1: classification losses (weighted cross-entropy + cardinality error)
# ----------------------------------------------------------------------------
def _cls_losses_kernel(logits_ref,   # (1, Q, CP) f32, classes padded w/ -1e9
                       tgt_ref,      # (1, Q, 1)  i32, target class per query
                       ew_ref,       # (1, CP)    f32, class weights (pad = 0)
                       tlen_ref,     # (B,)       i32 in SMEM, #targets / image
                       out_ref,      # (B, 3)     f32 in SMEM: num, den, card
                       *, num_classes: int):
    b = pl.program_id(0)

    logits = logits_ref[0]                       # (Q, CP)
    q, cp = logits.shape
    tgt = tgt_ref[0]                             # (Q, 1) int32
    ew = ew_ref[...]                             # (1, CP)

    class_iota = jax.lax.broadcasted_iota(jnp.int32, (q, cp), 1)
    onehot = class_iota == tgt                   # (Q, CP) bool

    # Numerically stable log-softmax pieces (padding lanes hold -1e9 -> exp=0).
    mx = jnp.max(logits, axis=-1, keepdims=True)                        # (Q,1)
    lse = mx + jnp.log(jnp.sum(jnp.exp(logits - mx), axis=-1, keepdims=True))
    logit_t = jnp.sum(jnp.where(onehot, logits, 0.0), axis=-1, keepdims=True)
    w_t = jnp.sum(jnp.where(onehot, ew, 0.0), axis=-1, keepdims=True)   # (Q,1)
    nll = lse - logit_t                                                  # (Q,1)

    ce_num = jnp.sum(w_t * nll)   # sum_q w[t_q] * (-log p[t_q])
    ce_den = jnp.sum(w_t)         # sum_q w[t_q]   (torch weighted-mean denom)

    # Cardinality: count queries whose argmax is NOT the no-object class.
    first_max = jnp.min(jnp.where(logits == mx, class_iota, cp),
                        axis=-1, keepdims=True)                          # (Q,1)
    card_pred = jnp.sum((first_max != num_classes).astype(jnp.float32))
    card_err = jnp.abs(card_pred - tlen_ref[b].astype(jnp.float32))

    out_ref[b, 0] = ce_num
    out_ref[b, 1] = ce_den
    out_ref[b, 2] = card_err


# ----------------------------------------------------------------------------
# Kernel 2: box losses (L1 + GIoU) on matched pairs
# ----------------------------------------------------------------------------
def _box_losses_kernel(boxes_ref,   # (8, NP) f32: rows 0-3 src cxcywh, 4-7 tgt
                       mask_ref,    # (1, NP) f32: 1 for real boxes, 0 for pad
                       out_ref):    # (2,)    f32 SMEM: [l1_sum, giou_loss_sum]
    bx = boxes_ref[...]
    m = mask_ref[...]

    # L1 over all 4 coords of every matched pair.
    l1 = jnp.sum(jnp.abs(bx[0:4, :] - bx[4:8, :]) * m)

    s_cx, s_cy, s_w, s_h = bx[0:1, :], bx[1:2, :], bx[2:3, :], bx[3:4, :]
    t_cx, t_cy, t_w, t_h = bx[4:5, :], bx[5:6, :], bx[6:7, :], bx[7:8, :]

    # center_to_corners_format
    s_x1, s_y1 = s_cx - 0.5 * s_w, s_cy - 0.5 * s_h
    s_x2, s_y2 = s_cx + 0.5 * s_w, s_cy + 0.5 * s_h
    t_x1, t_y1 = t_cx - 0.5 * t_w, t_cy - 0.5 * t_h
    t_x2, t_y2 = t_cx + 0.5 * t_w, t_cy + 0.5 * t_h

    area_s = (s_x2 - s_x1) * (s_y2 - s_y1)
    area_t = (t_x2 - t_x1) * (t_y2 - t_y1)

    inter = (jnp.maximum(jnp.minimum(s_x2, t_x2) - jnp.maximum(s_x1, t_x1), 0.0)
             * jnp.maximum(jnp.minimum(s_y2, t_y2) - jnp.maximum(s_y1, t_y1), 0.0))
    union = area_s + area_t - inter

    encl = (jnp.maximum(jnp.maximum(s_x2, t_x2) - jnp.minimum(s_x1, t_x1), 0.0)
            * jnp.maximum(jnp.maximum(s_y2, t_y2) - jnp.minimum(s_y1, t_y1), 0.0))

    valid = m > 0.0
    union_s = jnp.where(valid, union, 1.0)   # avoid 0/0 on padded lanes
    encl_s = jnp.where(valid, encl, 1.0)

    iou = inter / union_s
    giou = iou - (encl_s - union_s) / encl_s
    giou_loss = jnp.sum((1.0 - giou) * m)

    out_ref[0] = l1
    out_ref[1] = giou_loss


# ----------------------------------------------------------------------------
# Wrapper: DetrLoss.forward
# ----------------------------------------------------------------------------
def detr_loss(outputs, targets, indices, *, num_classes, eos_coef, losses):
    """Forward of DetrLoss (matcher result `indices` supplied precomputed)."""
    logits = outputs["logits"].astype(jnp.float32)          # (B, Q, C+1)
    pred_boxes = outputs["pred_boxes"].astype(jnp.float32)  # (B, Q, 4)
    B, Q, L = logits.shape  # L = num_classes + 1

    # --- host-side index bookkeeping (mirrors _get_source_permutation_idx) ---
    batch_idx = jnp.concatenate(
        [jnp.full(src.shape, i, dtype=jnp.int32) for i, (src, _) in enumerate(indices)])
    source_idx = jnp.concatenate([src.astype(jnp.int32) for src, _ in indices])
    target_classes_o = jnp.concatenate(
        [t["class_labels"][J].astype(jnp.int32) for t, (_, J) in zip(targets, indices)])
    target_classes = jnp.full((B, Q), num_classes, dtype=jnp.int32)
    target_classes = target_classes.at[batch_idx, source_idx].set(target_classes_o)
    target_lengths = jnp.array(
        [int(t["class_labels"].shape[0]) for t in targets], dtype=jnp.int32)
    num_boxes = float(max(sum(int(t["class_labels"].shape[0]) for t in targets), 1))

    loss_dict = {}

    # ------------------------- classification kernel ------------------------
    if ("labels" in losses) or ("cardinality" in losses):
        CP = 128 * int(pl.cdiv(L, 128))          # lane-dense class dim
        pad = CP - L
        logits_p = jnp.pad(logits, ((0, 0), (0, 0), (0, pad)),
                           constant_values=-1e9)
        empty_weight = jnp.ones((L,), jnp.float32).at[-1].set(eos_coef)
        ew_p = jnp.pad(empty_weight, (0, pad)).reshape(1, CP)
        tc = target_classes.reshape(B, Q, 1)

        cost = pl.CostEstimate(
            flops=8 * B * Q * CP,
            transcendentals=B * Q * (CP + 1),
            bytes_accessed=4 * (B * Q * CP + B * Q + CP + B * 3))

        cls_out = pl.pallas_call(
            functools.partial(_cls_losses_kernel, num_classes=num_classes),
            out_shape=jax.ShapeDtypeStruct((B, 3), jnp.float32),
            grid=(B,),
            in_specs=[
                pl.BlockSpec((1, Q, CP), lambda b: (b, 0, 0)),
                pl.BlockSpec((1, Q, 1), lambda b: (b, 0, 0)),
                pl.BlockSpec((1, CP), lambda b: (0, 0)),
                pl.BlockSpec(memory_space=pltpu.MemorySpace.SMEM),
            ],
            out_specs=pl.BlockSpec(memory_space=pltpu.MemorySpace.SMEM),
            compiler_params=pltpu.CompilerParams(
                dimension_semantics=("arbitrary",)),
            cost_estimate=cost,
        )(logits_p, tc, ew_p, target_lengths)

        if "labels" in losses:
            loss_dict["loss_ce"] = jnp.sum(cls_out[:, 0]) / jnp.sum(cls_out[:, 1])
        if "cardinality" in losses:
            loss_dict["cardinality_error"] = jnp.mean(cls_out[:, 2])

    # ------------------------------ box kernel ------------------------------
    if "boxes" in losses:
        source_boxes = pred_boxes[batch_idx, source_idx]            # (N, 4)
        target_boxes = jnp.concatenate(
            [t["boxes"][J].astype(jnp.float32)
             for t, (_, J) in zip(targets, indices)], axis=0)       # (N, 4)
        N = int(source_boxes.shape[0])
        NP = 128 * int(pl.cdiv(max(N, 1), 128))

        packed = jnp.zeros((8, NP), jnp.float32)
        packed = packed.at[0:4, :N].set(source_boxes.T)
        packed = packed.at[4:8, :N].set(target_boxes.T)
        mask = jnp.zeros((1, NP), jnp.float32).at[0, :N].set(1.0)

        box_out = pl.pallas_call(
            _box_losses_kernel,
            out_shape=jax.ShapeDtypeStruct((2,), jnp.float32),
            grid=(1,),
            in_specs=[
                pl.BlockSpec((8, NP), lambda i: (0, 0)),
                pl.BlockSpec((1, NP), lambda i: (0, 0)),
            ],
            out_specs=pl.BlockSpec(memory_space=pltpu.MemorySpace.SMEM),
            compiler_params=pltpu.CompilerParams(
                dimension_semantics=("arbitrary",)),
        )(packed, mask)

        loss_dict["loss_bbox"] = box_out[0] / num_boxes
        loss_dict["loss_giou"] = box_out[1] / num_boxes

    return loss_dict


# ----------------------------------------------------------------------------
# Pure-JAX reference reproducing the PyTorch DetrLoss forward
# ----------------------------------------------------------------------------
def _reference_detr_loss(outputs, targets, indices, *, num_classes, eos_coef):
    logits = outputs["logits"].astype(jnp.float32)
    pred_boxes = outputs["pred_boxes"].astype(jnp.float32)
    B, Q, L = logits.shape
    empty_weight = jnp.ones((L,), jnp.float32).at[-1].set(eos_coef)

    batch_idx = jnp.concatenate(
        [jnp.full(src.shape, i, dtype=jnp.int32) for i, (src, _) in enumerate(indices)])
    source_idx = jnp.concatenate([src.astype(jnp.int32) for src, _ in indices])
    tco = jnp.concatenate(
        [t["class_labels"][J].astype(jnp.int32) for t, (_, J) in zip(targets, indices)])
    target_classes = jnp.full((B, Q), num_classes, jnp.int32)
    target_classes = target_classes.at[batch_idx, source_idx].set(tco)

    logp = jax.nn.log_softmax(logits, axis=-1)
    nll = -jnp.take_along_axis(logp, target_classes[..., None], axis=-1)[..., 0]
    w = empty_weight[target_classes]
    loss_ce = jnp.sum(w * nll) / jnp.sum(w)

    tl = jnp.array([t["class_labels"].shape[0] for t in targets], jnp.float32)
    card_pred = jnp.sum(jnp.argmax(logits, -1) != (L - 1), axis=1).astype(jnp.float32)
    card_err = jnp.mean(jnp.abs(card_pred - tl))

    sb = pred_boxes[batch_idx, source_idx]
    tb = jnp.concatenate(
        [t["boxes"][J].astype(jnp.float32) for t, (_, J) in zip(targets, indices)], 0)
    num_boxes = float(max(sum(int(t["class_labels"].shape[0]) for t in targets), 1))
    loss_bbox = jnp.sum(jnp.abs(sb - tb)) / num_boxes

    def c2c(b):
        return jnp.stack([b[:, 0] - 0.5 * b[:, 2], b[:, 1] - 0.5 * b[:, 3],
                          b[:, 0] + 0.5 * b[:, 2], b[:, 1] + 0.5 * b[:, 3]], -1)

    s, t = c2c(sb), c2c(tb)
    area1 = (s[:, 2] - s[:, 0]) * (s[:, 3] - s[:, 1])
    area2 = (t[:, 2] - t[:, 0]) * (t[:, 3] - t[:, 1])
    lt = jnp.maximum(s[:, :2], t[:, :2]); rb = jnp.minimum(s[:, 2:], t[:, 2:])
    wh = jnp.clip(rb - lt, 0.0); inter = wh[:, 0] * wh[:, 1]
    union = area1 + area2 - inter; iou = inter / union
    lt2 = jnp.minimum(s[:, :2], t[:, :2]); rb2 = jnp.maximum(s[:, 2:], t[:, 2:])
    wh2 = jnp.clip(rb2 - lt2, 0.0); area = wh2[:, 0] * wh2[:, 1]
    giou = iou - (area - union) / area
    loss_giou = jnp.sum(1.0 - giou) / num_boxes

    return dict(loss_ce=loss_ce, cardinality_error=card_err,
                loss_bbox=loss_bbox, loss_giou=loss_giou)


if __name__ == "__main__":
    B, Q, num_classes = 2, 8, 6          # small shapes consistent with DETR
    L = num_classes + 1
    eos_coef = 0.1
    losses = ["labels", "cardinality", "boxes"]

    key = jax.random.PRNGKey(0)
    k_log, k_pb1, k_pb2, k_c1, k_b1, k_c2, k_b2 = jax.random.split(key, 7)

    logits = jax.random.normal(k_log, (B, Q, L), jnp.float32)
    pred_cxcy = jax.random.uniform(k_pb1, (B, Q, 2), jnp.float32, 0.25, 0.75)
    pred_wh = jax.random.uniform(k_pb2, (B, Q, 2), jnp.float32, 0.05, 0.30)
    pred_boxes = jnp.concatenate([pred_cxcy, pred_wh], -1)
    outputs = {"logits": logits, "pred_boxes": pred_boxes}

    def make_boxes(k, n):
        cxcy = jax.random.uniform(k, (n, 2), jnp.float32, 0.2, 0.8)
        wh = jax.random.uniform(jax.random.fold_in(k, 1), (n, 2), jnp.float32, 0.05, 0.3)
        return jnp.concatenate([cxcy, wh], -1)

    targets = [
        {"class_labels": jax.random.randint(k_c1, (3,), 0, num_classes).astype(jnp.int32),
         "boxes": make_boxes(k_b1, 3)},
        {"class_labels": jax.random.randint(k_c2, (2,), 0, num_classes).astype(jnp.int32),
         "boxes": make_boxes(k_b2, 2)},
    ]
    # Precomputed matcher assignment (source query idx, target idx) per image.
    indices = [
        (jnp.array([0, 2, 4], jnp.int32), jnp.array([0, 1, 2], jnp.int32)),
        (jnp.array([1, 3], jnp.int32), jnp.array([1, 0], jnp.int32)),
    ]

    got = detr_loss(outputs, targets, indices,
                    num_classes=num_classes, eos_coef=eos_coef, losses=losses)
    got = {k: jax.block_until_ready(v) for k, v in got.items()}

    ref = _reference_detr_loss(outputs, targets, indices,
                               num_classes=num_classes, eos_coef=eos_coef)

    for name in ["loss_ce", "cardinality_error", "loss_bbox", "loss_giou"]:
        assert name in got, f"missing loss {name}"
        assert jnp.allclose(got[name], ref[name], atol=1e-4, rtol=1e-4), (
            f"{name}: kernel={got[name]} ref={ref[name]}")

    print("KERNEL_OK")
</pallas_src>

<mosaic_0001>
module attributes {stable_mosaic.version = 11 : i64} {
  func.func @_cls_losses_kernel(%arg0: i32, %arg1: memref<1x8x128xf32, #tpu.memory_space<vmem>>, %arg2: memref<1x8x1xi32, #tpu.memory_space<vmem>>, %arg3: memref<1x128xf32, #tpu.memory_space<vmem>>, %arg4: memref<2xi32, #tpu.memory_space<smem>>, %arg5: memref<2x3xf32, #tpu.memory_space<smem>>) attributes {dimension_semantics = [#tpu.dimension_semantics<arbitrary>], iteration_bounds = array<i64: 2>, scalar_prefetch = 0 : i64, scratch_operands = 0 : i64, tpu.core_type = #tpu.core_type<tc>, window_params = [{transform_indices = @transform_0, window_bounds = array<i64: 1, 8, 128>}, {transform_indices = @transform_1, window_bounds = array<i64: 1, 8, 1>}, {pipeline_mode = #tpu.pipeline_mode<synchronous>, transform_indices = @transform_2, window_bounds = array<i64: 1, 128>}, {transform_indices = @transform_3, window_bounds = array<i64: 2>}, {transform_indices = @transform_4, window_bounds = array<i64: 2, 3>}]} {
    %c0 = arith.constant 0 : index
    %c0_0 = arith.constant 0 : index
    %c0_1 = arith.constant 0 : index
    %0 = vector.load %arg1[%c0, %c0_0, %c0_1] : memref<1x8x128xf32, #tpu.memory_space<vmem>>, vector<1x8x128xf32>
    %1 = vector.shape_cast %0 : vector<1x8x128xf32> to vector<8x128xf32>
    %c0_2 = arith.constant 0 : index
    %c0_3 = arith.constant 0 : index
    %c0_4 = arith.constant 0 : index
    %2 = vector.load %arg2[%c0_2, %c0_3, %c0_4] : memref<1x8x1xi32, #tpu.memory_space<vmem>>, vector<1x8x1xi32>
    %3 = vector.shape_cast %2 : vector<1x8x1xi32> to vector<8x1xi32>
    %c0_5 = arith.constant 0 : index
    %c0_6 = arith.constant 0 : index
    %4 = vector.load %arg3[%c0_5, %c0_6] : memref<1x128xf32, #tpu.memory_space<vmem>>, vector<1x128xf32>
    %5 = tpu.iota {dimensions = array<i32: 1>} : vector<8x128xi32>
    %6 = vector.broadcast %3 : vector<8x1xi32> to vector<8x128xi32>
    %7 = arith.cmpi eq, %5, %6 : vector<8x128xi32>
    %cst = arith.constant dense<0xFF800000> : vector<8xf32>
    %8 = vector.multi_reduction <maximumf>, %1, %cst [1] : vector<8x128xf32> to vector<8xf32>
    %9 = vector.shape_cast %8 : vector<8xf32> to vector<8x1xf32>
    %10 = vector.broadcast %9 : vector<8x1xf32> to vector<8x128xf32>
    %11 = arith.subf %1, %10 : vector<8x128xf32>
    %12 = math.exp %11 : vector<8x128xf32>
    %cst_7 = arith.constant dense<0.000000e+00> : vector<8xf32>
    %13 = vector.multi_reduction <add>, %12, %cst_7 [1] : vector<8x128xf32> to vector<8xf32>
    %14 = vector.shape_cast %13 : vector<8xf32> to vector<8x1xf32>
    %15 = math.log %14 : vector<8x1xf32>
    %16 = arith.addf %9, %15 : vector<8x1xf32>
    %cst_8 = arith.constant 0.000000e+00 : f32
    %17 = vector.broadcast %cst_8 : f32 to vector<8x128xf32>
    %18 = arith.select %7, %1, %17 : vector<8x128xi1>, vector<8x128xf32>
    %cst_9 = arith.constant dense<0.000000e+00> : vector<8xf32>
    %19 = vector.multi_reduction <add>, %18, %cst_9 [1] : vector<8x128xf32> to vector<8xf32>
    %20 = vector.shape_cast %19 : vector<8xf32> to vector<8x1xf32>
    %cst_10 = arith.constant 0.000000e+00 : f32
    %21 = vector.shape_cast %4 : vector<1x128xf32> to vector<1x128xf32>
    %22 = vector.broadcast %21 : vector<1x128xf32> to vector<8x128xf32>
    %23 = vector.broadcast %cst_10 : f32 to vector<8x128xf32>
    %24 = arith.select %7, %22, %23 : vector<8x128xi1>, vector<8x128xf32>
    %cst_11 = arith.constant dense<0.000000e+00> : vector<8xf32>
    %25 = vector.multi_reduction <add>, %24, %cst_11 [1] : vector<8x128xf32> to vector<8xf32>
    %26 = vector.shape_cast %25 : vector<8xf32> to vector<8x1xf32>
    %27 = arith.subf %16, %20 : vector<8x1xf32>
    %28 = arith.mulf %26, %27 : vector<8x1xf32>
    %29 = vector.shape_cast %28 : vector<8x1xf32> to vector<1x8x1xf32>
    %cst_12 = arith.constant dense<0.000000e+00> : vector<1xf32>
    %30 = vector.multi_reduction <add>, %29, %cst_12 [1, 2] : vector<1x8x1xf32> to vector<1xf32>
    %31 = vector.shape_cast %30 : vector<1xf32> to vector<1x1x1xf32>
    %32 = vector.extract %31[0, 0, 0] : f32 from vector<1x1x1xf32>
    %33 = vector.shape_cast %26 : vector<8x1xf32> to vector<1x8x1xf32>
    %cst_13 = arith.constant dense<0.000000e+00> : vector<1xf32>
    %34 = vector.multi_reduction <add>, %33, %cst_13 [1, 2] : vector<1x8x1xf32> to vector<1xf32>
    %35 = vector.shape_cast %34 : vector<1xf32> to vector<1x1x1xf32>
    %36 = vector.extract %35[0, 0, 0] : f32 from vector<1x1x1xf32>
    %37 = vector.broadcast %9 : vector<8x1xf32> to vector<8x128xf32>
    %38 = arith.cmpf oeq, %1, %37 : vector<8x128xf32>
    %c128_i32 = arith.constant 128 : i32
    %39 = vector.broadcast %c128_i32 : i32 to vector<8x128xi32>
    %40 = arith.select %38, %5, %39 : vector<8x128xi1>, vector<8x128xi32>
    %cst_14 = arith.constant dense<2147483647> : vector<8xi32>
    %41 = vector.multi_reduction <minsi>, %40, %cst_14 [1] : vector<8x128xi32> to vector<8xi32>
    %42 = vector.shape_cast %41 : vector<8xi32> to vector<8x1xi32>
    %c6_i32 = arith.constant 6 : i32
    %43 = vector.broadcast %c6_i32 : i32 to vector<8x1xi32>
    %44 = arith.cmpi ne, %42, %43 : vector<8x1xi32>
    %45 = arith.extui %44 : vector<8x1xi1> to vector<8x1xi32>
    %46 = arith.sitofp %45 : vector<8x1xi32> to vector<8x1xf32>
    %47 = vector.shape_cast %46 : vector<8x1xf32> to vector<1x8x1xf32>
    %cst_15 = arith.constant dense<0.000000e+00> : vector<1xf32>
    %48 = vector.multi_reduction <add>, %47, %cst_15 [1, 2] : vector<1x8x1xf32> to vector<1xf32>
    %49 = vector.shape_cast %48 : vector<1xf32> to vector<1x1x1xf32>
    %50 = vector.extract %49[0, 0, 0] : f32 from vector<1x1x1xf32>
    %51 = arith.index_cast %arg0 : i32 to index
    %52 = memref.load %arg4[%51] : memref<2xi32, #tpu.memory_space<smem>>
    %53 = arith.sitofp %52 : i32 to f32
    %54 = arith.subf %50, %53 : f32
    %55 = math.absf %54 : f32
    %56 = arith.index_cast %arg0 : i32 to index
    %c0_16 = arith.constant 0 : index
    %57 = memref.load %arg5[%56, %c0_16] : memref<2x3xf32, #tpu.memory_space<smem>>
    memref.store %32, %arg5[%56, %c0_16] : memref<2x3xf32, #tpu.memory_space<smem>>
    %58 = arith.index_cast %arg0 : i32 to index
    %c1 = arith.constant 1 : index
    %59 = memref.load %arg5[%58, %c1] : memref<2x3xf32, #tpu.memory_space<smem>>
    memref.store %36, %arg5[%58, %c1] : memref<2x3xf32, #tpu.memory_space<smem>>
    %60 = arith.index_cast %arg0 : i32 to index
    %c2 = arith.constant 2 : index
    %61 = memref.load %arg5[%60, %c2] : memref<2x3xf32, #tpu.memory_space<smem>>
    memref.store %55, %arg5[%60, %c2] : memref<2x3xf32, #tpu.memory_space<smem>>
    return
  }
  func.func @transform_0(%arg0: i32) -> (i32, i32, i32) {
    %c0_i32 = arith.constant 0 : i32
    %c0_i32_0 = arith.constant 0 : i32
    %c0_i32_1 = arith.constant 0 : i32
    return %arg0, %c0_i32, %c0_i32_0 : i32, i32, i32
  }
  func.func @transform_1(%arg0: i32) -> (i32, i32, i32) {
    %c0_i32 = arith.constant 0 : i32
    %c0_i32_0 = arith.constant 0 : i32
    %c0_i32_1 = arith.constant 0 : i32
    return %arg0, %c0_i32, %c0_i32_0 : i32, i32, i32
  }
  func.func @transform_2(%arg0: i32) -> (i32, i32) {
    %c0_i32 = arith.constant 0 : i32
    %c0_i32_0 = arith.constant 0 : i32
    %c0_i32_1 = arith.constant 0 : i32
    return %c0_i32, %c0_i32_0 : i32, i32
  }
  func.func @transform_3(%arg0: i32) -> i32 {
    %c0_i32 = arith.constant 0 : i32
    %c0_i32_0 = arith.constant 0 : i32
    return %c0_i32 : i32
  }
  func.func @transform_4(%arg0: i32) -> (i32, i32) {
    %c0_i32 = arith.constant 0 : i32
    %c0_i32_0 = arith.constant 0 : i32
    %c0_i32_1 = arith.constant 0 : i32
    return %c0_i32, %c0_i32_0 : i32, i32
  }
}

</mosaic_0001>

<bundles_post_ra>
// kernel: tpu_custom_call.1
= control target key start
LH: loop header
LB: loop body
LE: loop exit
PB: predicated region body
PF: predicated region fallthrough
CT: control target
= control target key end

     0   :  { %9 = vsyncpa [#allocation4], 0  ;;  %s571_s0 = inlined_call_operand.vmem [shape: f32[2,8,128], index: 0, kind: input, shape index: {}]   ;;  %s572_s1 = inlined_call_operand.vmem [shape: s32[2,8,1], index: 1, kind: input, shape index: {}]   ;;  %s573_s2 = inlined_call_operand.vmem [shape: f32[1,128], index: 2, kind: input, shape index: {}]   ;;  %s574_s3 = inlined_call_operand.vmem [shape: s32[2], index: 3, kind: input, shape index: {}]   ;;  %s575_s4 = inlined_call_operand.hbm [shape: f32[2,3], index: 4, kind: output, shape index: {}]  }
   0x1   :  { %10 = vsyncpa [#allocation3], 0  ;;  %s514_s15 = smov 0  }
   0x2 LB: > { %s520_s16 = sadd.s32 4294967295, %s483_s15   ;;  %p386_p0 = scmp.ge.s32.totalorder %s483_s15, 1  ;;  %s483_s15 = sphi %s514_s15, %s16_s15  }
   0x3   : > { %p136_p1 = scmp.lt.s32.totalorder %s483_s15, 3  ;;  %s152_s19 = sshll.u32 %s574_s3, 4  ;;  %s153_s19 = int_to_ptr.vmem [resolvable:$true] %s152_s19 }
   0x4   : > { %p420_p3 = scmp.eq.s32.totalorder %s520_s16, 0  ;;  %s442_s21 = scalar_lea.vmem %s153_s19, 16 }
   0x5   : > { %p527_p2 = pnand %p386_p0, %p136_p1  ;;  %p443_p6 = scmp.ne.s32.totalorder %s153_s19, %s442_s21 }
   0x6   : > { %p450_p10 = scmp.lt.s32.totalorder %s153_s19, %s153_s19  ;;  %p451_p11 = scmp.lt.s32.totalorder %s442_s21, %s442_s21 }
   0x7   : > { %p416_p4 = pneg %p527_p2 }
   0x8   : > { %p452_p12 = por %p451_p11, %p450_p10 }
   0x9   : > { %p417_p5 = pnand %p420_p3, %p416_p4 }
   0xb   : > { %p444_p7 = pneg %p417_p5 }
   0xd   : > { %p445_p8 = pnand %p444_p7, %p443_p6 }
   0xf   : > { %p446_p9 = pneg %p445_p8 }
  0x11   : > { %p453_p13 = pnand %p452_p12, %p446_p9 }
  0x13   : > { %456 = shalt.err (!%p453_p13)
}
  0x14   : > { %s485_s22 = smov [#allocation2]   ;;  %179 = sbr.rel (%p527_p2) target bundleno = 698 (0x2ba), region = 36 }
  0x15   : > { %419 = dma.vmem_to_smem (!%p417_p5), %s153_s19, 16, %s485_s22, [#allocation4]  }
  0x1b   : > { %474 = dma.done.wait (%p420_p3), [#allocation4], 16  }
  0x1c   : > { %476 = vsyncadd (%p420_p3), [#allocation4], 4294967280 }
  0x1d   : > { %185 = sfence }
  0x1e   : > { %p204_p0 = scmp.lt.s32.totalorder %s520_s16, 1  ;;  %v486_v0 = vmov 0   ;;  %v215_v3 = vlaneseq  ;;  %v393_v18 = vld [vmem:[%s573_s2] ss:$0 sm:$0xff]  ;;  %vm245_vm3 = vcmask 7168   ;;  %v487_v35 = vmov 0.0  }
  0x1f   : > { %436 = vset.pattern.permute.xlu1 %v486_v0  ;;  %437 = vset.pattern.permute.xlu0 %v486_v0  ;;  %s295_s7 = sld [smem:[#allocation2 + %s520_s16]]  ;;  %s395_s8 = sshll.u32 %s520_s16, 7 }
  0x20   : > { %s205_s23 = scalar_select %p204_p0, %s520_s16, 1  ;;  %v216_v4 = vand.u32 127, %v215_v3 }
  0x21   : > { %s300_s9 = scalar_lea.smem [#allocation5], %s395_s8  ;;  %p422_p1 = scmp.eq.s32.totalorder %s520_s16, 1 }
  0x22   : > { %s391_s24 = sshll.u32 %s205_s23, 3  ;;  %s349_s10 = scalar_lea.smem %s300_s9, 1 [#allocation5] }
  0x23   : > { %s207_s27 = scalar_lea.vmem %s571_s0, %s391_s24  ;;  %s211_s30 = scalar_lea.vmem %s572_s1, %s391_s24 }
  0x24   : > { %v212_v1 = vld [vmem:[%s207_s27] sm:$0xff]  ;;  %s352_s17 = scalar_lea.smem %s300_s9, 2 [#allocation5]  ;;  %s457_s22 = scalar_lea.hbm %s575_s4, 32 }
  0x25   : > { %v213_v2 = vld [vmem:[%s211_s30] sm:$0xff]  ;;  %221 = vmax.xlane.f32.xlu0 %v212_v1  ;;  %s296_s12 = scvt.s32.f32 %s295_s7  ;;  %p458_p2 = scmp.ne.s32.totalorder %s575_s4, %s457_s22 }
  0x26   : > { %218 = vperm.xlu1 %436, %v213_v2   ;;  %p463_p5 = scmp.lt.u32.totalorder %s457_s22, %s575_s4 }
  0x27   : > { %p459_p3 = pnand %p458_p2, %p422_p1 }
  0x29   : > { %p460_p4 = pneg %p459_p3 }
  0x2b   : > { %p465_p6 = pnand %p463_p5, %p460_p4 }
  0xa5   : > { %v219_v8 = vpop.permute.xlu1 %218 }
  0xa6   : > { %vm220_vm1 = vcmp.eq.s32.totalorder %v216_v4, %v219_v8 }
  0xa7   : > { %v231_v12 = vsel %vm220_vm1, %v212_v1, 0.0  ;;  %v240_v19 = vsel %vm220_vm1, %v393_v18, 0.0 }
  0xb2   : > { %v222_v5 = vpop.xlane.xlu0 %221 }
  0xb3   : > { %v223_v6 = vsub.f32 %v212_v1, %v222_v5  ;;  %vm266_vm0 = vcmp.eq.f32.partialorder %v212_v1, %v222_v5 }
  0xb4   : > { %v267_v7 = vsel %vm266_vm0, %v216_v4, 128 }
  0xb5   : > { %v224_v9 = vmul.f32 1.442695, %v223_v6  ;;  %v269_v10 = vshra.s32 %v267_v7, 16  ;;  %v268_v14 = vand.u32 65535, %v267_v7 }
  0xb7   : > { %438 = vpow2.f32 %v224_v9  ;;  %v271_v11 = vcvt.s32.f32 %v269_v10  ;;  %v270_v16 = vcvt.s32.f32 %v268_v14 }
  0xb9   : > { %272 = vmin.xlane.f32.xlu0 %v271_v11 }
  0xbd   : > { %232 = vadd.xlane.f32.xlu0 %v231_v12 }
  0xc1   : > { %v439_v13 = vpop.eup %438 }
  0xc2   : > { %226 = vadd.xlane.f32.xlu1 %v439_v13 }
 0x146   : > { %v273_v15 = vpop.xlane.xlu0 %272 }
 0x147   : > { %vm274_vm2 = vcmp.eq.f32.partialorder %v271_v11, %v273_v15  ;;  %v279_v24 = vcvt.f32.s32 %v273_v15 }
 0x148   : > { %v275_v17 = vsel %vm274_vm2, %v270_v16, inf }
 0x149   : > { %276 = vmin.xlane.f32.xlu0 %v275_v17  ;;  %v280_v27 = vshll.u32 %v279_v24, 16 }
 0x14a   : > { %v233_v23 = vpop.xlane.xlu0 %232 }
 0x14d   : > { %241 = vadd.xlane.f32.xlu0 %v240_v19 }
 0x14f   : > { %v227_v20 = vpop.xlane.xlu1 %226 }
 0x150   : > { %440 = vlog2.f32 %v227_v20 }
 0x15a   : > { %v441_v21 = vpop.eup %440 }
 0x15b   : > { %v229_v22 = vmul.f32 0.6931472, %v441_v21 }
 0x15d   : > { %v230_v25 = vadd.f32 %v229_v22, %v222_v5 }
 0x15f   : > { %v243_v29 = vsub.f32 %v230_v25, %v233_v23 }
 0x1d6   : > { %v277_v26 = vpop.xlane.xlu0 %276 }
 0x1d7   : > { %v278_v28 = vcvt.f32.s32 %v277_v26 }
 0x1d9   : > { %v281_v30 = vadd.s32 %v280_v27, %v278_v28 }
 0x1da   : > { %v242_v31 = vpop.xlane.xlu0 %241 }
 0x1db   : > { %v244_v32 = vmul.f32 %v243_v29, %v242_v31  ;;  %v256_v33 = vsel %vm245_vm3, %v242_v31, 0.0  ;;  %vm282_vm4 = vcmp.ne.s32.totalorder %v281_v30, 6 }
 0x1dc   : > { %257 = vadd.xlane.f32.xlu0 %v256_v33  ;;  %v394_v36 = vsel %vm282_vm4, 1.0, %v487_v35 }
 0x1dd   : > { %v246_v34 = vsel %vm245_vm3, %v244_v32, 0.0  ;;  %v285_v37 = vsel %vm245_vm3, %v394_v36, 0.0 }
 0x1e0   : > { %247 = vadd.xlane.f32.xlu0 %v246_v34 }
 0x1e4   : > { %286 = vadd.xlane.f32.xlu0 %v285_v37 }
 0x269   : > { %v258_v38 = vpop.xlane.xlu0 %257 }
 0x26a   : > { %v259_v39 = vrot.slane %v258_v38, 4 }
 0x26c   : > { %v260_v40 = vadd.f32 %v259_v39, %v258_v38 }
 0x26d   : > { %v248_v41 = vpop.xlane.xlu0 %247 }
 0x26e   : > { %v261_v42 = vrot.slane %v260_v40, 2  ;;  %v249_v43 = vrot.slane %v248_v41, 4 }
 0x270   : > { %v250_v44 = vadd.f32 %v249_v43, %v248_v41  ;;  %v262_v46 = vadd.f32 %v261_v42, %v260_v40 }
 0x271   : > { %v287_v45 = vpop.xlane.xlu0 %286 }
 0x272   : > { %v251_v47 = vrot.slane %v250_v44, 2  ;;  %v288_v48 = vrot.slane %v287_v45, 4  ;;  %v263_v51 = vrot.slane %v262_v46, 1 }
 0x274   : > { %v289_v49 = vadd.f32 %v288_v48, %v287_v45  ;;  %v252_v50 = vadd.f32 %v251_v47, %v250_v44  ;;  %v264_v56 = vadd.f32 %v263_v51, %v262_v46 }
 0x276   : > { %v290_v52 = vrot.slane %v289_v49, 2  ;;  %v253_v53 = vrot.slane %v252_v50, 1 }
 0x278   : > { %v291_v54 = vadd.f32 %v290_v52, %v289_v49  ;;  %v254_v55 = vadd.f32 %v253_v53, %v252_v50 }
 0x27a   : > { %402 = vpush %v254_v55  ;;  %v292_v57 = vrot.slane %v291_v54, 1 }
 0x27b   : > { %404 = vpush %v264_v56 }
 0x27c   : > { %v293_v58 = vadd.f32 %v292_v57, %v291_v54 }
 0x27e   : > { %406 = vpush %v293_v58 }
 0x2ab   : > { %s403_s11 = spop %402 }
 0x2ac   : > { %301 = sst [smem:[%s300_s9]] %s403_s11  ;;  %s405_s13 = spop %404 }
 0x2ad   : > { %304 = sst [smem:[%s349_s10]] %s405_s13 }
 0x2af   : > { %s407_s14 = spop %406 }
 0x2b0   : > { %s297_s18 = ssub.f32 %s407_s14, %s296_s12 }
 0x2b2   : > { %s298_s19 = sand.u32 2147483647, %s297_s18 }
 0x2b3   : > { %307 = sst [smem:[%s352_s17]] %s298_s19 }
 0x2b4   : > { %468 = shalt.err (!%p465_p6)
}
 0x2b5   : > { %s488_s27 = smov [#allocation5]  }
 0x2b6   : > { %413 = dma.smem_to_hbm (%p422_p1), %s488_s27, 32, %s575_s4, [#allocation3]  }
 0x2b7   : > { %478 = dma.done.wait (%p422_p1), [#allocation3], 32  }
 0x2b8   : > { %480 = vsyncadd (%p422_p1), [#allocation3], 4294967264 }
 0x2b9   : > { %321 = sfence }
 0x2ba PF: > { %s16_s15 = sadd.s32 1, %s483_s15  }
 0x2bb   : > { %p13_p7 = scmp.ge.s32.totalorder %s16_s15, 4  }
 0x2bd   :  { %15 = sbr.rel (!%p13_p7) target bundleno = 2 (0x2), region = 74 }
 0x2c4   :  { %327 = vsyncpa [#allocation3], 1 }
 0x2c5   :  { %329 = vsyncpa [#allocation3 + $0x1], 1 }
 0x2c6   :  { %330 = vsyncpa [#allocation4], 1 }
 0x2c7   :  { %332 = vsyncpa [#allocation4 + $0x1], 1 }

</bundles_post_ra>
